<compile_context>
chip_gen: v7x
topology: tpu7x:2x2x1
jax: 0.10.0
libtpu: 0.0.40
codegen_flags: <defaults>
</compile_context>

<pallas_src>
import functools

import jax
import jax.numpy as jnp
import numpy as np
from jax.experimental import pallas as pl
from jax.experimental.pallas import tpu as pltpu


def lstm_head_kernel(x_ref, wih_ref, whh_ref, b_ref,
                     w1_ref, b1_ref, w2_ref, b2_ref,
                     out_ref, *, seq_len, batch, hidden_dim):
    T, B, H = seq_len, batch, hidden_dim

    wih = wih_ref[...]                                   # (I, 4H)  i/f/o cols pre-scaled by 0.5
    whh = whh_ref[...]                                   # (H, 4H)  i/f/o cols pre-scaled by 0.5
    bias = jnp.broadcast_to(b_ref[...], (B, 4 * H))      # hoisted broadcast (not re-emitted per step)

    # ---- hoisted input projection (off the recurrent critical path) --------
    # x_ref keeps the batch_first (B, T, I) layout; x_ref[:, t, :] is a cheap
    # strided VMEM load.  All T matmuls are independent of h, so the scheduler
    # can overlap them with the serial recurrence below.
    gx = [jnp.dot(x_ref[:, t, :], wih, preferred_element_type=jnp.float32) + bias
          for t in range(T)]                             # T x (B, 4H)

    h = jnp.zeros((B, H), jnp.float32)
    c = jnp.zeros((B, H), jnp.float32)

    # ---- fully unrolled recurrence; h/c stay register-resident -------------
    for t in range(T):
        gates = gx[t] + jnp.dot(h, whh, preferred_element_type=jnp.float32)

        # Single transcendental pass over the whole (B, 4H) vreg.  Because the
        # i/f/o pre-activations were pre-halved in the weights/bias, their
        # sigmoids are recovered with VPU mul/add only.
        tg = jnp.tanh(gates)
        i_g = 0.5 * (tg[:, 0 * H:1 * H] + 1.0)
        f_g = 0.5 * (tg[:, 1 * H:2 * H] + 1.0)
        g_g = tg[:, 2 * H:3 * H]                          # unscaled column -> tanh(z) directly
        o_g = 0.5 * (tg[:, 3 * H:4 * H] + 1.0)

        c = f_g * c + i_g * g_g
        h = o_g * jnp.tanh(c)

    # ---- head: softmax(fc2(relu(fc1(hn))), dim=1) ---------------------------
    z1 = jnp.dot(h, w1_ref[...], preferred_element_type=jnp.float32) + b1_ref[...]
    z1 = jnp.maximum(z1, 0.0)
    z2 = jnp.dot(z1, w2_ref[...], preferred_element_type=jnp.float32) + b2_ref[...]
    z2 = z2 - jnp.max(z2, axis=1, keepdims=True)
    e = jnp.exp(z2)
    out_ref[...] = e / jnp.sum(e, axis=1, keepdims=True)


def lstm_forward(x, kernel_params):
    """x: (B, T, I) float32 (PyTorch batch_first layout). Returns (B, output_size).

    `kernel_params` must come from prepare_kernel_params (gate-scaled weights)."""
    B, T, I = x.shape
    wih_t, whh_t, b_sum, w1_t, b1, w2_t, b2 = kernel_params
    H = whh_t.shape[0]
    O = w2_t.shape[1]

    # Alignment guard (review item 5): free per-step vreg slicing inside the
    # kernel relies on B filling whole sublane groups (multiple of 8) and 4H
    # filling whole lane groups (multiple of 128).  Pad in the wrapper if these
    # shapes ever change.
    assert B % 8 == 0 and (4 * H) % 128 == 0, "pad B to a multiple of 8 and 4H to a multiple of 128"

    kernel = functools.partial(lstm_head_kernel, seq_len=T, batch=B, hidden_dim=H)
    vmem = lambda: pl.BlockSpec(memory_space=pltpu.MemorySpace.VMEM)

    return pl.pallas_call(
        kernel,
        out_shape=jax.ShapeDtypeStruct((B, O), jnp.float32),
        in_specs=[vmem() for _ in range(8)],
        out_specs=vmem(),
    )(x, wih_t, whh_t, b_sum, w1_t, b1, w2_t, b2)


def prepare_kernel_params(params):
    """One-time (off hot path) weight folding for the single-EUP-pass identity:
    scale the i/f/o gate columns (0:H, H:2H, 3H:4H) of W_ih^T, W_hh^T and the
    fused bias by 0.5; leave the g (tanh) gate columns unscaled."""
    wih_t, whh_t, b_sum, w1_t, b1, w2_t, b2 = params
    H = whh_t.shape[0]
    col_scale = jnp.concatenate([
        jnp.full((H,), 0.5, jnp.float32),   # i
        jnp.full((H,), 0.5, jnp.float32),   # f
        jnp.ones((H,), jnp.float32),        # g
        jnp.full((H,), 0.5, jnp.float32),   # o
    ])
    return (wih_t * col_scale, whh_t * col_scale, b_sum * col_scale,
            w1_t, b1, w2_t, b2)


def lstm_forward_ref(x, params):
    """Pure-JAX reference with PyTorch semantics (unscaled params)."""
    wih_t, whh_t, b_sum, w1_t, b1, w2_t, b2 = params
    B, T, I = x.shape
    H = whh_t.shape[0]
    h = jnp.zeros((B, H), jnp.float32)
    c = jnp.zeros((B, H), jnp.float32)
    for t in range(T):
        g = x[:, t, :] @ wih_t + h @ whh_t + b_sum
        i_g = jax.nn.sigmoid(g[:, 0 * H:1 * H])
        f_g = jax.nn.sigmoid(g[:, 1 * H:2 * H])
        g_g = jnp.tanh(g[:, 2 * H:3 * H])
        o_g = jax.nn.sigmoid(g[:, 3 * H:4 * H])
        c = f_g * c + i_g * g_g
        h = o_g * jnp.tanh(c)
    z1 = jnp.maximum(h @ w1_t + b1, 0.0)
    z2 = z1 @ w2_t + b2
    return jax.nn.softmax(z2, axis=1)


def init_params(key, input_size, hidden_dim, output_size):
    H, I, O = hidden_dim, input_size, output_size
    H2 = H // 2
    ks = jax.random.split(key, 8)
    s = 1.0 / np.sqrt(H)
    # PyTorch stores W_ih:(4H,I), W_hh:(4H,H); we keep them pre-transposed.
    wih_t = jax.random.uniform(ks[0], (I, 4 * H), jnp.float32, -s, s)
    whh_t = jax.random.uniform(ks[1], (H, 4 * H), jnp.float32, -s, s)
    b_ih = jax.random.uniform(ks[2], (4 * H,), jnp.float32, -s, s)
    b_hh = jax.random.uniform(ks[3], (4 * H,), jnp.float32, -s, s)
    b_sum = (b_ih + b_hh).reshape(1, 4 * H)
    w1_t = jax.random.uniform(ks[4], (H, H2), jnp.float32, -s, s)
    b1 = jax.random.uniform(ks[5], (H2,), jnp.float32, -s, s).reshape(1, H2)
    w2_t = jax.random.uniform(ks[6], (H2, O), jnp.float32, -s, s)
    b2 = jax.random.uniform(ks[7], (O,), jnp.float32, -s, s).reshape(1, O)
    return (wih_t, whh_t, b_sum, w1_t, b1, w2_t, b2)


if __name__ == "__main__":
    # Small shapes consistent with the module: batch=8, seq=8, input=16,
    # hidden=32 (hidden//2=16), output=4. drop_prob=None path (no dropout).
    B, T, I, H, O = 8, 8, 16, 32, 4
    key = jax.random.PRNGKey(0)
    k_x, k_p = jax.random.split(key)
    x = jax.random.normal(k_x, (B, T, I), jnp.float32)
    params = init_params(k_p, I, H, O)
    kparams = prepare_kernel_params(params)   # one-time weight folding, off the hot path

    out = lstm_forward(x, kparams)
    out = jax.block_until_ready(out)

    ref = lstm_forward_ref(x, params)
    np.testing.assert_allclose(np.asarray(out), np.asarray(ref), rtol=1e-5, atol=1e-5)

    print("KERNEL_OK")
</pallas_src>

<mosaic_0001>
module attributes {stable_mosaic.version = 11 : i64} {
  func.func @lstm_head_kernel(%arg0: memref<8x8x16xf32, #tpu.memory_space<vmem>>, %arg1: memref<16x128xf32, #tpu.memory_space<vmem>>, %arg2: memref<32x128xf32, #tpu.memory_space<vmem>>, %arg3: memref<1x128xf32, #tpu.memory_space<vmem>>, %arg4: memref<32x16xf32, #tpu.memory_space<vmem>>, %arg5: memref<1x16xf32, #tpu.memory_space<vmem>>, %arg6: memref<16x4xf32, #tpu.memory_space<vmem>>, %arg7: memref<1x4xf32, #tpu.memory_space<vmem>>, %arg8: memref<8x4xf32, #tpu.memory_space<vmem>>) attributes {dimension_semantics = [], scalar_prefetch = 0 : i64, scratch_operands = 0 : i64, tpu.core_type = #tpu.core_type<tc>} {
    %c0 = arith.constant 0 : index
    %c0_0 = arith.constant 0 : index
    %0 = vector.load %arg1[%c0, %c0_0] : memref<16x128xf32, #tpu.memory_space<vmem>>, vector<16x128xf32>
    %c0_1 = arith.constant 0 : index
    %c0_2 = arith.constant 0 : index
    %1 = vector.load %arg2[%c0_1, %c0_2] : memref<32x128xf32, #tpu.memory_space<vmem>>, vector<32x128xf32>
    %c0_3 = arith.constant 0 : index
    %c0_4 = arith.constant 0 : index
    %2 = vector.load %arg3[%c0_3, %c0_4] : memref<1x128xf32, #tpu.memory_space<vmem>>, vector<1x128xf32>
    %3 = vector.shape_cast %2 : vector<1x128xf32> to vector<1x128xf32>
    %4 = vector.broadcast %3 : vector<1x128xf32> to vector<8x128xf32>
    %c0_5 = arith.constant 0 : index
    %c0_6 = arith.constant 0 : index
    %c0_7 = arith.constant 0 : index
    %5 = vector.load %arg0[%c0_5, %c0_6, %c0_7] : memref<8x8x16xf32, #tpu.memory_space<vmem>>, vector<8x1x16xf32>
    %6 = vector.shape_cast %5 : vector<8x1x16xf32> to vector<8x16xf32>
    %cst = arith.constant dense<0.000000e+00> : vector<8x128xf32>
    %7 = tpu.matmul %6, %0, %cst {dimension_numbers = #tpu.dot_dimension_numbers<[1], [0], [0], [1], [0, 0, 1, 1], [], []>} : vector<8x16xf32>, vector<16x128xf32>, vector<8x128xf32> -> vector<8x128xf32>
    %8 = arith.addf %7, %4 : vector<8x128xf32>
    %c0_8 = arith.constant 0 : index
    %c1 = arith.constant 1 : index
    %c0_9 = arith.constant 0 : index
    %9 = vector.load %arg0[%c0_8, %c1, %c0_9] : memref<8x8x16xf32, #tpu.memory_space<vmem>>, vector<8x1x16xf32>
    %10 = vector.shape_cast %9 : vector<8x1x16xf32> to vector<8x16xf32>
    %cst_10 = arith.constant dense<0.000000e+00> : vector<8x128xf32>
    %11 = tpu.matmul %10, %0, %cst_10 {dimension_numbers = #tpu.dot_dimension_numbers<[1], [0], [0], [1], [0, 0, 1, 1], [], []>} : vector<8x16xf32>, vector<16x128xf32>, vector<8x128xf32> -> vector<8x128xf32>
    %12 = arith.addf %11, %4 : vector<8x128xf32>
    %c0_11 = arith.constant 0 : index
    %c2 = arith.constant 2 : index
    %c0_12 = arith.constant 0 : index
    %13 = vector.load %arg0[%c0_11, %c2, %c0_12] : memref<8x8x16xf32, #tpu.memory_space<vmem>>, vector<8x1x16xf32>
    %14 = vector.shape_cast %13 : vector<8x1x16xf32> to vector<8x16xf32>
    %cst_13 = arith.constant dense<0.000000e+00> : vector<8x128xf32>
    %15 = tpu.matmul %14, %0, %cst_13 {dimension_numbers = #tpu.dot_dimension_numbers<[1], [0], [0], [1], [0, 0, 1, 1], [], []>} : vector<8x16xf32>, vector<16x128xf32>, vector<8x128xf32> -> vector<8x128xf32>
    %16 = arith.addf %15, %4 : vector<8x128xf32>
    %c0_14 = arith.constant 0 : index
    %c3 = arith.constant 3 : index
    %c0_15 = arith.constant 0 : index
    %17 = vector.load %arg0[%c0_14, %c3, %c0_15] : memref<8x8x16xf32, #tpu.memory_space<vmem>>, vector<8x1x16xf32>
    %18 = vector.shape_cast %17 : vector<8x1x16xf32> to vector<8x16xf32>
    %cst_16 = arith.constant dense<0.000000e+00> : vector<8x128xf32>
    %19 = tpu.matmul %18, %0, %cst_16 {dimension_numbers = #tpu.dot_dimension_numbers<[1], [0], [0], [1], [0, 0, 1, 1], [], []>} : vector<8x16xf32>, vector<16x128xf32>, vector<8x128xf32> -> vector<8x128xf32>
    %20 = arith.addf %19, %4 : vector<8x128xf32>
    %c0_17 = arith.constant 0 : index
    %c4 = arith.constant 4 : index
    %c0_18 = arith.constant 0 : index
    %21 = vector.load %arg0[%c0_17, %c4, %c0_18] : memref<8x8x16xf32, #tpu.memory_space<vmem>>, vector<8x1x16xf32>
    %22 = vector.shape_cast %21 : vector<8x1x16xf32> to vector<8x16xf32>
    %cst_19 = arith.constant dense<0.000000e+00> : vector<8x128xf32>
    %23 = tpu.matmul %22, %0, %cst_19 {dimension_numbers = #tpu.dot_dimension_numbers<[1], [0], [0], [1], [0, 0, 1, 1], [], []>} : vector<8x16xf32>, vector<16x128xf32>, vector<8x128xf32> -> vector<8x128xf32>
    %24 = arith.addf %23, %4 : vector<8x128xf32>
    %c0_20 = arith.constant 0 : index
    %c5 = arith.constant 5 : index
    %c0_21 = arith.constant 0 : index
    %25 = vector.load %arg0[%c0_20, %c5, %c0_21] : memref<8x8x16xf32, #tpu.memory_space<vmem>>, vector<8x1x16xf32>
    %26 = vector.shape_cast %25 : vector<8x1x16xf32> to vector<8x16xf32>
    %cst_22 = arith.constant dense<0.000000e+00> : vector<8x128xf32>
    %27 = tpu.matmul %26, %0, %cst_22 {dimension_numbers = #tpu.dot_dimension_numbers<[1], [0], [0], [1], [0, 0, 1, 1], [], []>} : vector<8x16xf32>, vector<16x128xf32>, vector<8x128xf32> -> vector<8x128xf32>
    %28 = arith.addf %27, %4 : vector<8x128xf32>
    %c0_23 = arith.constant 0 : index
    %c6 = arith.constant 6 : index
    %c0_24 = arith.constant 0 : index
    %29 = vector.load %arg0[%c0_23, %c6, %c0_24] : memref<8x8x16xf32, #tpu.memory_space<vmem>>, vector<8x1x16xf32>
    %30 = vector.shape_cast %29 : vector<8x1x16xf32> to vector<8x16xf32>
    %cst_25 = arith.constant dense<0.000000e+00> : vector<8x128xf32>
    %31 = tpu.matmul %30, %0, %cst_25 {dimension_numbers = #tpu.dot_dimension_numbers<[1], [0], [0], [1], [0, 0, 1, 1], [], []>} : vector<8x16xf32>, vector<16x128xf32>, vector<8x128xf32> -> vector<8x128xf32>
    %32 = arith.addf %31, %4 : vector<8x128xf32>
    %c0_26 = arith.constant 0 : index
    %c7 = arith.constant 7 : index
    %c0_27 = arith.constant 0 : index
    %33 = vector.load %arg0[%c0_26, %c7, %c0_27] : memref<8x8x16xf32, #tpu.memory_space<vmem>>, vector<8x1x16xf32>
    %34 = vector.shape_cast %33 : vector<8x1x16xf32> to vector<8x16xf32>
    %cst_28 = arith.constant dense<0.000000e+00> : vector<8x128xf32>
    %35 = tpu.matmul %34, %0, %cst_28 {dimension_numbers = #tpu.dot_dimension_numbers<[1], [0], [0], [1], [0, 0, 1, 1], [], []>} : vector<8x16xf32>, vector<16x128xf32>, vector<8x128xf32> -> vector<8x128xf32>
    %36 = arith.addf %35, %4 : vector<8x128xf32>
    %cst_29 = arith.constant 0.000000e+00 : f32
    %37 = vector.broadcast %cst_29 : f32 to vector<8x32xf32>
    %cst_30 = arith.constant 0.000000e+00 : f32
    %38 = vector.broadcast %cst_30 : f32 to vector<8x32xf32>
    %cst_31 = arith.constant dense<0.000000e+00> : vector<8x128xf32>
    %39 = tpu.matmul %37, %1, %cst_31 {dimension_numbers = #tpu.dot_dimension_numbers<[1], [0], [0], [1], [0, 0, 1, 1], [], []>} : vector<8x32xf32>, vector<32x128xf32>, vector<8x128xf32> -> vector<8x128xf32>
    %40 = arith.addf %8, %39 : vector<8x128xf32>
    %41 = math.tanh %40 : vector<8x128xf32>
    %42 = vector.extract_strided_slice %41 {offsets = [0, 0], sizes = [8, 32], strides = [1, 1]} : vector<8x128xf32> to vector<8x32xf32>
    %cst_32 = arith.constant 1.000000e+00 : f32
    %43 = vector.broadcast %cst_32 : f32 to vector<8x32xf32>
    %44 = arith.addf %42, %43 : vector<8x32xf32>
    %cst_33 = arith.constant 5.000000e-01 : f32
    %45 = vector.broadcast %cst_33 : f32 to vector<8x32xf32>
    %46 = arith.mulf %45, %44 : vector<8x32xf32>
    %47 = vector.extract_strided_slice %41 {offsets = [0, 32], sizes = [8, 32], strides = [1, 1]} : vector<8x128xf32> to vector<8x32xf32>
    %cst_34 = arith.constant 1.000000e+00 : f32
    %48 = vector.broadcast %cst_34 : f32 to vector<8x32xf32>
    %49 = arith.addf %47, %48 : vector<8x32xf32>
    %cst_35 = arith.constant 5.000000e-01 : f32
    %50 = vector.broadcast %cst_35 : f32 to vector<8x32xf32>
    %51 = arith.mulf %50, %49 : vector<8x32xf32>
    %52 = vector.extract_strided_slice %41 {offsets = [0, 64], sizes = [8, 32], strides = [1, 1]} : vector<8x128xf32> to vector<8x32xf32>
    %53 = vector.extract_strided_slice %41 {offsets = [0, 96], sizes = [8, 32], strides = [1, 1]} : vector<8x128xf32> to vector<8x32xf32>
    %cst_36 = arith.constant 1.000000e+00 : f32
    %54 = vector.broadcast %cst_36 : f32 to vector<8x32xf32>
    %55 = arith.addf %53, %54 : vector<8x32xf32>
    %cst_37 = arith.constant 5.000000e-01 : f32
    %56 = vector.broadcast %cst_37 : f32 to vector<8x32xf32>
    %57 = arith.mulf %56, %55 : vector<8x32xf32>
    %58 = arith.mulf %51, %38 : vector<8x32xf32>
    %59 = arith.mulf %46, %52 : vector<8x32xf32>
    %60 = arith.addf %58, %59 : vector<8x32xf32>
    %61 = math.tanh %60 : vector<8x32xf32>
    %62 = arith.mulf %57, %61 : vector<8x32xf32>
    %cst_38 = arith.constant dense<0.000000e+00> : vector<8x128xf32>
    %63 = tpu.matmul %62, %1, %cst_38 {dimension_numbers = #tpu.dot_dimension_numbers<[1], [0], [0], [1], [0, 0, 1, 1], [], []>} : vector<8x32xf32>, vector<32x128xf32>, vector<8x128xf32> -> vector<8x128xf32>
    %64 = arith.addf %12, %63 : vector<8x128xf32>
    %65 = math.tanh %64 : vector<8x128xf32>
    %66 = vector.extract_strided_slice %65 {offsets = [0, 0], sizes = [8, 32], strides = [1, 1]} : vector<8x128xf32> to vector<8x32xf32>
    %cst_39 = arith.constant 1.000000e+00 : f32
    %67 = vector.broadcast %cst_39 : f32 to vector<8x32xf32>
    %68 = arith.addf %66, %67 : vector<8x32xf32>
    %cst_40 = arith.constant 5.000000e-01 : f32
    %69 = vector.broadcast %cst_40 : f32 to vector<8x32xf32>
    %70 = arith.mulf %69, %68 : vector<8x32xf32>
    %71 = vector.extract_strided_slice %65 {offsets = [0, 32], sizes = [8, 32], strides = [1, 1]} : vector<8x128xf32> to vector<8x32xf32>
    %cst_41 = arith.constant 1.000000e+00 : f32
    %72 = vector.broadcast %cst_41 : f32 to vector<8x32xf32>
    %73 = arith.addf %71, %72 : vector<8x32xf32>
    %cst_42 = arith.constant 5.000000e-01 : f32
    %74 = vector.broadcast %cst_42 : f32 to vector<8x32xf32>
    %75 = arith.mulf %74, %73 : vector<8x32xf32>
    %76 = vector.extract_strided_slice %65 {offsets = [0, 64], sizes = [8, 32], strides = [1, 1]} : vector<8x128xf32> to vector<8x32xf32>
    %77 = vector.extract_strided_slice %65 {offsets = [0, 96], sizes = [8, 32], strides = [1, 1]} : vector<8x128xf32> to vector<8x32xf32>
    %cst_43 = arith.constant 1.000000e+00 : f32
    %78 = vector.broadcast %cst_43 : f32 to vector<8x32xf32>
    %79 = arith.addf %77, %78 : vector<8x32xf32>
    %cst_44 = arith.constant 5.000000e-01 : f32
    %80 = vector.broadcast %cst_44 : f32 to vector<8x32xf32>
    %81 = arith.mulf %80, %79 : vector<8x32xf32>
    %82 = arith.mulf %75, %60 : vector<8x32xf32>
    %83 = arith.mulf %70, %76 : vector<8x32xf32>
    %84 = arith.addf %82, %83 : vector<8x32xf32>
    %85 = math.tanh %84 : vector<8x32xf32>
    %86 = arith.mulf %81, %85 : vector<8x32xf32>
    %cst_45 = arith.constant dense<0.000000e+00> : vector<8x128xf32>
    %87 = tpu.matmul %86, %1, %cst_45 {dimension_numbers = #tpu.dot_dimension_numbers<[1], [0], [0], [1], [0, 0, 1, 1], [], []>} : vector<8x32xf32>, vector<32x128xf32>, vector<8x128xf32> -> vector<8x128xf32>
    %88 = arith.addf %16, %87 : vector<8x128xf32>
    %89 = math.tanh %88 : vector<8x128xf32>
    %90 = vector.extract_strided_slice %89 {offsets = [0, 0], sizes = [8, 32], strides = [1, 1]} : vector<8x128xf32> to vector<8x32xf32>
    %cst_46 = arith.constant 1.000000e+00 : f32
    %91 = vector.broadcast %cst_46 : f32 to vector<8x32xf32>
    %92 = arith.addf %90, %91 : vector<8x32xf32>
    %cst_47 = arith.constant 5.000000e-01 : f32
    %93 = vector.broadcast %cst_47 : f32 to vector<8x32xf32>
    %94 = arith.mulf %93, %92 : vector<8x32xf32>
    %95 = vector.extract_strided_slice %89 {offsets = [0, 32], sizes = [8, 32], strides = [1, 1]} : vector<8x128xf32> to vector<8x32xf32>
    %cst_48 = arith.constant 1.000000e+00 : f32
    %96 = vector.broadcast %cst_48 : f32 to vector<8x32xf32>
    %97 = arith.addf %95, %96 : vector<8x32xf32>
    %cst_49 = arith.constant 5.000000e-01 : f32
    %98 = vector.broadcast %cst_49 : f32 to vector<8x32xf32>
    %99 = arith.mulf %98, %97 : vector<8x32xf32>
    %100 = vector.extract_strided_slice %89 {offsets = [0, 64], sizes = [8, 32], strides = [1, 1]} : vector<8x128xf32> to vector<8x32xf32>
    %101 = vector.extract_strided_slice %89 {offsets = [0, 96], sizes = [8, 32], strides = [1, 1]} : vector<8x128xf32> to vector<8x32xf32>
    %cst_50 = arith.constant 1.000000e+00 : f32
    %102 = vector.broadcast %cst_50 : f32 to vector<8x32xf32>
    %103 = arith.addf %101, %102 : vector<8x32xf32>
    %cst_51 = arith.constant 5.000000e-01 : f32
    %104 = vector.broadcast %cst_51 : f32 to vector<8x32xf32>
    %105 = arith.mulf %104, %103 : vector<8x32xf32>
    %106 = arith.mulf %99, %84 : vector<8x32xf32>
    %107 = arith.mulf %94, %100 : vector<8x32xf32>
    %108 = arith.addf %106, %107 : vector<8x32xf32>
    %109 = math.tanh %108 : vector<8x32xf32>
    %110 = arith.mulf %105, %109 : vector<8x32xf32>
    %cst_52 = arith.constant dense<0.000000e+00> : vector<8x128xf32>
    %111 = tpu.matmul %110, %1, %cst_52 {dimension_numbers = #tpu.dot_dimension_numbers<[1], [0], [0], [1], [0, 0, 1, 1], [], []>} : vector<8x32xf32>, vector<32x128xf32>, vector<8x128xf32> -> vector<8x128xf32>
    %112 = arith.addf %20, %111 : vector<8x128xf32>
    %113 = math.tanh %112 : vector<8x128xf32>
    %114 = vector.extract_strided_slice %113 {offsets = [0, 0], sizes = [8, 32], strides = [1, 1]} : vector<8x128xf32> to vector<8x32xf32>
    %cst_53 = arith.constant 1.000000e+00 : f32
    %115 = vector.broadcast %cst_53 : f32 to vector<8x32xf32>
    %116 = arith.addf %114, %115 : vector<8x32xf32>
    %cst_54 = arith.constant 5.000000e-01 : f32
    %117 = vector.broadcast %cst_54 : f32 to vector<8x32xf32>
    %118 = arith.mulf %117, %116 : vector<8x32xf32>
    %119 = vector.extract_strided_slice %113 {offsets = [0, 32], sizes = [8, 32], strides = [1, 1]} : vector<8x128xf32> to vector<8x32xf32>
    %cst_55 = arith.constant 1.000000e+00 : f32
    %120 = vector.broadcast %cst_55 : f32 to vector<8x32xf32>
    %121 = arith.addf %119, %120 : vector<8x32xf32>
    %cst_56 = arith.constant 5.000000e-01 : f32
    %122 = vector.broadcast %cst_56 : f32 to vector<8x32xf32>
    %123 = arith.mulf %122, %121 : vector<8x32xf32>
    %124 = vector.extract_strided_slice %113 {offsets = [0, 64], sizes = [8, 32], strides = [1, 1]} : vector<8x128xf32> to vector<8x32xf32>
    %125 = vector.extract_strided_slice %113 {offsets = [0, 96], sizes = [8, 32], strides = [1, 1]} : vector<8x128xf32> to vector<8x32xf32>
    %cst_57 = arith.constant 1.000000e+00 : f32
    %126 = vector.broadcast %cst_57 : f32 to vector<8x32xf32>
    %127 = arith.addf %125, %126 : vector<8x32xf32>
    %cst_58 = arith.constant 5.000000e-01 : f32
    %128 = vector.broadcast %cst_58 : f32 to vector<8x32xf32>
    %129 = arith.mulf %128, %127 : vector<8x32xf32>
    %130 = arith.mulf %123, %108 : vector<8x32xf32>
    %131 = arith.mulf %118, %124 : vector<8x32xf32>
    %132 = arith.addf %130, %131 : vector<8x32xf32>
    %133 = math.tanh %132 : vector<8x32xf32>
    %134 = arith.mulf %129, %133 : vector<8x32xf32>
    %cst_59 = arith.constant dense<0.000000e+00> : vector<8x128xf32>
    %135 = tpu.matmul %134, %1, %cst_59 {dimension_numbers = #tpu.dot_dimension_numbers<[1], [0], [0], [1], [0, 0, 1, 1], [], []>} : vector<8x32xf32>, vector<32x128xf32>, vector<8x128xf32> -> vector<8x128xf32>
    %136 = arith.addf %24, %135 : vector<8x128xf32>
    %137 = math.tanh %136 : vector<8x128xf32>
    %138 = vector.extract_strided_slice %137 {offsets = [0, 0], sizes = [8, 32], strides = [1, 1]} : vector<8x128xf32> to vector<8x32xf32>
    %cst_60 = arith.constant 1.000000e+00 : f32
    %139 = vector.broadcast %cst_60 : f32 to vector<8x32xf32>
    %140 = arith.addf %138, %139 : vector<8x32xf32>
    %cst_61 = arith.constant 5.000000e-01 : f32
    %141 = vector.broadcast %cst_61 : f32 to vector<8x32xf32>
    %142 = arith.mulf %141, %140 : vector<8x32xf32>
    %143 = vector.extract_strided_slice %137 {offsets = [0, 32], sizes = [8, 32], strides = [1, 1]} : vector<8x128xf32> to vector<8x32xf32>
    %cst_62 = arith.constant 1.000000e+00 : f32
    %144 = vector.broadcast %cst_62 : f32 to vector<8x32xf32>
    %145 = arith.addf %143, %144 : vector<8x32xf32>
    %cst_63 = arith.constant 5.000000e-01 : f32
    %146 = vector.broadcast %cst_63 : f32 to vector<8x32xf32>
    %147 = arith.mulf %146, %145 : vector<8x32xf32>
    %148 = vector.extract_strided_slice %137 {offsets = [0, 64], sizes = [8, 32], strides = [1, 1]} : vector<8x128xf32> to vector<8x32xf32>
    %149 = vector.extract_strided_slice %137 {offsets = [0, 96], sizes = [8, 32], strides = [1, 1]} : vector<8x128xf32> to vector<8x32xf32>
    %cst_64 = arith.constant 1.000000e+00 : f32
    %150 = vector.broadcast %cst_64 : f32 to vector<8x32xf32>
    %151 = arith.addf %149, %150 : vector<8x32xf32>
    %cst_65 = arith.constant 5.000000e-01 : f32
    %152 = vector.broadcast %cst_65 : f32 to vector<8x32xf32>
    %153 = arith.mulf %152, %151 : vector<8x32xf32>
    %154 = arith.mulf %147, %132 : vector<8x32xf32>
    %155 = arith.mulf %142, %148 : vector<8x32xf32>
    %156 = arith.addf %154, %155 : vector<8x32xf32>
    %157 = math.tanh %156 : vector<8x32xf32>
    %158 = arith.mulf %153, %157 : vector<8x32xf32>
    %cst_66 = arith.constant dense<0.000000e+00> : vector<8x128xf32>
    %159 = tpu.matmul %158, %1, %cst_66 {dimension_numbers = #tpu.dot_dimension_numbers<[1], [0], [0], [1], [0, 0, 1, 1], [], []>} : vector<8x32xf32>, vector<32x128xf32>, vector<8x128xf32> -> vector<8x128xf32>
    %160 = arith.addf %28, %159 : vector<8x128xf32>
    %161 = math.tanh %160 : vector<8x128xf32>
    %162 = vector.extract_strided_slice %161 {offsets = [0, 0], sizes = [8, 32], strides = [1, 1]} : vector<8x128xf32> to vector<8x32xf32>
    %cst_67 = arith.constant 1.000000e+00 : f32
    %163 = vector.broadcast %cst_67 : f32 to vector<8x32xf32>
    %164 = arith.addf %162, %163 : vector<8x32xf32>
    %cst_68 = arith.constant 5.000000e-01 : f32
    %165 = vector.broadcast %cst_68 : f32 to vector<8x32xf32>
    %166 = arith.mulf %165, %164 : vector<8x32xf32>
    %167 = vector.extract_strided_slice %161 {offsets = [0, 32], sizes = [8, 32], strides = [1, 1]} : vector<8x128xf32> to vector<8x32xf32>
    %cst_69 = arith.constant 1.000000e+00 : f32
    %168 = vector.broadcast %cst_69 : f32 to vector<8x32xf32>
    %169 = arith.addf %167, %168 : vector<8x32xf32>
    %cst_70 = arith.constant 5.000000e-01 : f32
    %170 = vector.broadcast %cst_70 : f32 to vector<8x32xf32>
    %171 = arith.mulf %170, %169 : vector<8x32xf32>
    %172 = vector.extract_strided_slice %161 {offsets = [0, 64], sizes = [8, 32], strides = [1, 1]} : vector<8x128xf32> to vector<8x32xf32>
    %173 = vector.extract_strided_slice %161 {offsets = [0, 96], sizes = [8, 32], strides = [1, 1]} : vector<8x128xf32> to vector<8x32xf32>
    %cst_71 = arith.constant 1.000000e+00 : f32
    %174 = vector.broadcast %cst_71 : f32 to vector<8x32xf32>
    %175 = arith.addf %173, %174 : vector<8x32xf32>
    %cst_72 = arith.constant 5.000000e-01 : f32
    %176 = vector.broadcast %cst_72 : f32 to vector<8x32xf32>
    %177 = arith.mulf %176, %175 : vector<8x32xf32>
    %178 = arith.mulf %171, %156 : vector<8x32xf32>
    %179 = arith.mulf %166, %172 : vector<8x32xf32>
    %180 = arith.addf %178, %179 : vector<8x32xf32>
    %181 = math.tanh %180 : vector<8x32xf32>
    %182 = arith.mulf %177, %181 : vector<8x32xf32>
    %cst_73 = arith.constant dense<0.000000e+00> : vector<8x128xf32>
    %183 = tpu.matmul %182, %1, %cst_73 {dimension_numbers = #tpu.dot_dimension_numbers<[1], [0], [0], [1], [0, 0, 1, 1], [], []>} : vector<8x32xf32>, vector<32x128xf32>, vector<8x128xf32> -> vector<8x128xf32>
    %184 = arith.addf %32, %183 : vector<8x128xf32>
    %185 = math.tanh %184 : vector<8x128xf32>
    %186 = vector.extract_strided_slice %185 {offsets = [0, 0], sizes = [8, 32], strides = [1, 1]} : vector<8x128xf32> to vector<8x32xf32>
    %cst_74 = arith.constant 1.000000e+00 : f32
    %187 = vector.broadcast %cst_74 : f32 to vector<8x32xf32>
    %188 = arith.addf %186, %187 : vector<8x32xf32>
    %cst_75 = arith.constant 5.000000e-01 : f32
    %189 = vector.broadcast %cst_75 : f32 to vector<8x32xf32>
    %190 = arith.mulf %189, %188 : vector<8x32xf32>
    %191 = vector.extract_strided_slice %185 {offsets = [0, 32], sizes = [8, 32], strides = [1, 1]} : vector<8x128xf32> to vector<8x32xf32>
    %cst_76 = arith.constant 1.000000e+00 : f32
    %192 = vector.broadcast %cst_76 : f32 to vector<8x32xf32>
    %193 = arith.addf %191, %192 : vector<8x32xf32>
    %cst_77 = arith.constant 5.000000e-01 : f32
    %194 = vector.broadcast %cst_77 : f32 to vector<8x32xf32>
    %195 = arith.mulf %194, %193 : vector<8x32xf32>
    %196 = vector.extract_strided_slice %185 {offsets = [0, 64], sizes = [8, 32], strides = [1, 1]} : vector<8x128xf32> to vector<8x32xf32>
    %197 = vector.extract_strided_slice %185 {offsets = [0, 96], sizes = [8, 32], strides = [1, 1]} : vector<8x128xf32> to vector<8x32xf32>
    %cst_78 = arith.constant 1.000000e+00 : f32
    %198 = vector.broadcast %cst_78 : f32 to vector<8x32xf32>
    %199 = arith.addf %197, %198 : vector<8x32xf32>
    %cst_79 = arith.constant 5.000000e-01 : f32
    %200 = vector.broadcast %cst_79 : f32 to vector<8x32xf32>
    %201 = arith.mulf %200, %199 : vector<8x32xf32>
    %202 = arith.mulf %195, %180 : vector<8x32xf32>
    %203 = arith.mulf %190, %196 : vector<8x32xf32>
    %204 = arith.addf %202, %203 : vector<8x32xf32>
    %205 = math.tanh %204 : vector<8x32xf32>
    %206 = arith.mulf %201, %205 : vector<8x32xf32>
    %cst_80 = arith.constant dense<0.000000e+00> : vector<8x128xf32>
    %207 = tpu.matmul %206, %1, %cst_80 {dimension_numbers = #tpu.dot_dimension_numbers<[1], [0], [0], [1], [0, 0, 1, 1], [], []>} : vector<8x32xf32>, vector<32x128xf32>, vector<8x128xf32> -> vector<8x128xf32>
    %208 = arith.addf %36, %207 : vector<8x128xf32>
    %209 = math.tanh %208 : vector<8x128xf32>
    %210 = vector.extract_strided_slice %209 {offsets = [0, 0], sizes = [8, 32], strides = [1, 1]} : vector<8x128xf32> to vector<8x32xf32>
    %cst_81 = arith.constant 1.000000e+00 : f32
    %211 = vector.broadcast %cst_81 : f32 to vector<8x32xf32>
    %212 = arith.addf %210, %211 : vector<8x32xf32>
    %cst_82 = arith.constant 5.000000e-01 : f32
    %213 = vector.broadcast %cst_82 : f32 to vector<8x32xf32>
    %214 = arith.mulf %213, %212 : vector<8x32xf32>
    %215 = vector.extract_strided_slice %209 {offsets = [0, 32], sizes = [8, 32], strides = [1, 1]} : vector<8x128xf32> to vector<8x32xf32>
    %cst_83 = arith.constant 1.000000e+00 : f32
    %216 = vector.broadcast %cst_83 : f32 to vector<8x32xf32>
    %217 = arith.addf %215, %216 : vector<8x32xf32>
    %cst_84 = arith.constant 5.000000e-01 : f32
    %218 = vector.broadcast %cst_84 : f32 to vector<8x32xf32>
    %219 = arith.mulf %218, %217 : vector<8x32xf32>
    %220 = vector.extract_strided_slice %209 {offsets = [0, 64], sizes = [8, 32], strides = [1, 1]} : vector<8x128xf32> to vector<8x32xf32>
    %221 = vector.extract_strided_slice %209 {offsets = [0, 96], sizes = [8, 32], strides = [1, 1]} : vector<8x128xf32> to vector<8x32xf32>
    %cst_85 = arith.constant 1.000000e+00 : f32
    %222 = vector.broadcast %cst_85 : f32 to vector<8x32xf32>
    %223 = arith.addf %221, %222 : vector<8x32xf32>
    %cst_86 = arith.constant 5.000000e-01 : f32
    %224 = vector.broadcast %cst_86 : f32 to vector<8x32xf32>
    %225 = arith.mulf %224, %223 : vector<8x32xf32>
    %226 = arith.mulf %219, %204 : vector<8x32xf32>
    %227 = arith.mulf %214, %220 : vector<8x32xf32>
    %228 = arith.addf %226, %227 : vector<8x32xf32>
    %229 = math.tanh %228 : vector<8x32xf32>
    %230 = arith.mulf %225, %229 : vector<8x32xf32>
    %c0_87 = arith.constant 0 : index
    %c0_88 = arith.constant 0 : index
    %231 = vector.load %arg4[%c0_87, %c0_88] : memref<32x16xf32, #tpu.memory_space<vmem>>, vector<32x16xf32>
    %cst_89 = arith.constant dense<0.000000e+00> : vector<8x16xf32>
    %232 = tpu.matmul %230, %231, %cst_89 {dimension_numbers = #tpu.dot_dimension_numbers<[1], [0], [0], [1], [0, 0, 1, 1], [], []>} : vector<8x32xf32>, vector<32x16xf32>, vector<8x16xf32> -> vector<8x16xf32>
    %c0_90 = arith.constant 0 : index
    %c0_91 = arith.constant 0 : index
    %233 = vector.load %arg5[%c0_90, %c0_91] : memref<1x16xf32, #tpu.memory_space<vmem>>, vector<1x16xf32>
    %234 = vector.broadcast %233 : vector<1x16xf32> to vector<8x16xf32>
    %235 = arith.addf %232, %234 : vector<8x16xf32>
    %cst_92 = arith.constant 0.000000e+00 : f32
    %236 = vector.broadcast %cst_92 : f32 to vector<8x16xf32>
    %237 = arith.maximumf %235, %236 : vector<8x16xf32>
    %c0_93 = arith.constant 0 : index
    %c0_94 = arith.constant 0 : index
    %238 = vector.load %arg6[%c0_93, %c0_94] : memref<16x4xf32, #tpu.memory_space<vmem>>, vector<16x4xf32>
    %cst_95 = arith.constant dense<0.000000e+00> : vector<8x4xf32>
    %239 = tpu.matmul %237, %238, %cst_95 {dimension_numbers = #tpu.dot_dimension_numbers<[1], [0], [0], [1], [0, 0, 1, 1], [], []>} : vector<8x16xf32>, vector<16x4xf32>, vector<8x4xf32> -> vector<8x4xf32>
    %c0_96 = arith.constant 0 : index
    %c0_97 = arith.constant 0 : index
    %240 = vector.load %arg7[%c0_96, %c0_97] : memref<1x4xf32, #tpu.memory_space<vmem>>, vector<1x4xf32>
    %241 = vector.broadcast %240 : vector<1x4xf32> to vector<8x4xf32>
    %242 = arith.addf %239, %241 : vector<8x4xf32>
    %cst_98 = arith.constant dense<0xFF800000> : vector<8xf32>
    %243 = vector.multi_reduction <maximumf>, %242, %cst_98 [1] : vector<8x4xf32> to vector<8xf32>
    %244 = vector.shape_cast %243 : vector<8xf32> to vector<8x1xf32>
    %245 = vector.broadcast %244 : vector<8x1xf32> to vector<8x4xf32>
    %246 = arith.subf %242, %245 : vector<8x4xf32>
    %247 = math.exp %246 : vector<8x4xf32>
    %cst_99 = arith.constant dense<0.000000e+00> : vector<8xf32>
    %248 = vector.multi_reduction <add>, %247, %cst_99 [1] : vector<8x4xf32> to vector<8xf32>
    %249 = vector.shape_cast %248 : vector<8xf32> to vector<8x1xf32>
    %250 = vector.broadcast %249 : vector<8x1xf32> to vector<8x4xf32>
    %251 = arith.divf %247, %250 : vector<8x4xf32>
    %c0_100 = arith.constant 0 : index
    %c0_101 = arith.constant 0 : index
    %252 = vector.load %arg8[%c0_100, %c0_101] : memref<8x4xf32, #tpu.memory_space<vmem>>, vector<8x4xf32>
    tpu.vector_store %arg8[%c0_100, %c0_101], %251 {strides = array<i32>} : memref<8x4xf32, #tpu.memory_space<vmem>>, vector<8x4xf32>,
    return
  }
}

</mosaic_0001>

<bundles_post_ra>
// kernel: tpu_custom_call.1
= control target key start
LH: loop header
LB: loop body
LE: loop exit
PB: predicated region body
PF: predicated region fallthrough
CT: control target
= control target key end

     0   :  { %13 = vsyncpa [#allocation3], 0  ;;  %s2822_s0 = inlined_call_operand.vmem [shape: f32[8,8,16], index: 0, kind: input, shape index: {}]   ;;  %s2823_s1 = inlined_call_operand.hbm [shape: f32[16,128], index: 1, kind: input, shape index: {}]   ;;  %s2824_s2 = inlined_call_operand.hbm [shape: f32[32,128], index: 2, kind: input, shape index: {}]   ;;  %s2825_s3 = inlined_call_operand.vmem [shape: f32[1,128], index: 3, kind: input, shape index: {}]   ;;  %s2826_s4 = inlined_call_operand.vmem [shape: f32[32,16], index: 4, kind: input, shape index: {}]   ;;  %s2827_s5 = inlined_call_operand.vmem [shape: f32[1,16], index: 5, kind: input, shape index: {}]   ;;  %s2828_s6 = inlined_call_operand.vmem [shape: f32[16,4], index: 6, kind: input, shape index: {}]   ;;  %s2829_s7 = inlined_call_operand.vmem [shape: f32[1,4], index: 7, kind: input, shape index: {}]   ;;  %s2830_s8 = inlined_call_operand.vmem [shape: f32[8,4], index: 8, kind: output, shape index: {}]  }
   0x1   :  { %14 = vsyncpa [#allocation5], 0  ;;  %s2301_s27 = smov [#allocation2]   ;;  %s2253_s9 = scalar_lea.hbm %s2823_s1, 256 }
   0x2   :  { %s22_s28 = sshll.u32 %s2301_s27, 4  ;;  %p2254_p0 = scmp.ne.s32.totalorder %s2823_s1, %s2253_s9  ;;  %s23_s28 = int_to_ptr.vmem [resolvable:$true] %s22_s28 }
   0x3   :  { %p2257_p1 = scmp.lt.u32.totalorder %s2253_s9, %s2823_s1 }
   0x5   :  { %p2259_p2 = pnand %p2257_p1, %p2254_p0 }
   0x7   :  { %2262 = shalt.err (!%p2259_p2)
}
   0x8   :  { %s2263_s14 = scalar_lea.vmem %s23_s28, 256  ;;  %p2268_p4 = scmp.lt.s32.totalorder %s23_s28, %s23_s28 }
   0x9   :  { %p2264_p3 = scmp.ne.s32.totalorder %s23_s28, %s2263_s14  ;;  %p2269_p5 = scmp.lt.s32.totalorder %s2263_s14, %s2263_s14 }
   0xb   :  { %p2270_p6 = por %p2269_p5, %p2268_p4 }
   0xd   :  { %p2271_p7 = pnand %p2270_p6, %p2264_p3 }
   0xf   :  { %2274 = shalt.err (!%p2271_p7)
}
  0x10   :  { %s2302_s15 = smov 128   ;;  %s2303_s16 = smov 8  }
  0x11   :  { %28 = dma.hbm_to_vmem [thread:$0]  %s2823_s1, 256, %s23_s28, [#allocation3], %s2302_s15, %s2302_s15, %s2303_s16  }
  0x12   :  { %s2304_s19 = smov [#allocation4]   ;;  %s2275_s23 = scalar_lea.hbm %s2824_s2, 512 }
  0x13   :  { %s34_s20 = sshll.u32 %s2304_s19, 4  ;;  %p2276_p8 = scmp.ne.s32.totalorder %s2824_s2, %s2275_s23  ;;  %s35_s20 = int_to_ptr.vmem [resolvable:$true] %s34_s20 }
  0x14   :  { %p2279_p9 = scmp.lt.u32.totalorder %s2275_s23, %s2824_s2 }
  0x16   :  { %p2281_p10 = pnand %p2279_p9, %p2276_p8 }
  0x18   :  { %2284 = shalt.err (!%p2281_p10)
}
  0x19   :  { %s2285_s29 = scalar_lea.vmem %s35_s20, 512  ;;  %p2290_p12 = scmp.lt.s32.totalorder %s35_s20, %s35_s20 }
  0x1a   :  { %p2286_p11 = scmp.ne.s32.totalorder %s35_s20, %s2285_s29  ;;  %p2291_p13 = scmp.lt.s32.totalorder %s2285_s29, %s2285_s29 }
  0x1c   :  { %p2292_p0 = por %p2291_p13, %p2290_p12 }
  0x1e   :  { %p2293_p1 = pnand %p2292_p0, %p2286_p11 }
  0x20   :  { %2296 = shalt.err (!%p2293_p1)
}
  0x21   :  { %40 = dma.hbm_to_vmem [thread:$0]  %s2824_s2, 512, %s35_s20, [#allocation5], %s2302_s15, %s2302_s15, %s2303_s16  }
  0x22   :  { %2297 = dma.done.wait [#allocation3], 256  }
  0x23   :  { %2298 = vsyncadd [#allocation3], 4294967040 }
  0x24   :  { %2299 = dma.done.wait [#allocation5], 512  }
  0x25   :  { %2300 = vsyncadd [#allocation5], 4294966784  ;;  %v2305_v0 = vmov 0.0|0.0   ;;  %vm2306_vm0 = vmmov 0   ;;  %v2307_v1 = vmov 0.0   ;;  %vm87_vm1 = vcmask 1041409  }
  0x26   :  { %2103 = vmatprep.subr.bf16.mxu0 %v2305_v0  ;;  %1945 = vmatprep.mubr.msk.f32.mxu0 %vm2306_vm0, %v2307_v1  ;;  %vm90_vm2 = vcmask 1042434   ;;  %vm93_vm3 = vcmask 1043459   ;;  %vm96_vm4 = vcmask 1044484   ;;  %v57_v2 = vld [vmem:[#allocation2] sm:$0xff]  ;;  %v58_v3 = vld [vmem:[#allocation2 + $0x8] sm:$0xff]  ;;  %vm99_vm5 = vcmask 1045509  }
  0x27   :  { %2106 = vmatprep.subr.bf16.mxu1 %v2305_v0  ;;  %1952 = vmatprep.mubr.msk.f32.mxu1 %vm2306_vm0, %v2307_v1  ;;  %v70_v4 = vld [vmem:[%s2822_s0] sm:$0x1]  ;;  %vm102_vm6 = vcmask 1046534   ;;  %v2388_v5 = vpack.c.bf16 %v58_v3, %v57_v2  ;;  %v71_v6 = vld [vmem:[%s2822_s0 + $0x8] sm:$0x1]  ;;  %vm105_vm7 = vcmask 1047559  }
  0x28   :  { %v72_v7 = vld [vmem:[%s2822_s0 + $0x10] sm:$0x1]  ;;  %v73_v8 = vld [vmem:[%s2822_s0 + $0x18] sm:$0x1]  ;;  %v74_v9 = vld [vmem:[%s2822_s0 + $0x20] sm:$0x1] }
  0x29   :  { %v75_v10 = vld [vmem:[%s2822_s0 + $0x28] sm:$0x1]  ;;  %v76_v11 = vld [vmem:[%s2822_s0 + $0x30] sm:$0x1]  ;;  %2105 = vmatpush3.bf16.msra.mxu0 %v2388_v5  ;;  %v77_v12 = vld [vmem:[%s2822_s0 + $0x38] sm:$0x1]  ;;  %2108 = vmatpush3.bf16.msra.mxu1 %v2388_v5 }
  0x2a   :  { %v86_v13 = vrot.slane %v71_v6, 7  ;;  %v89_v14 = vrot.slane %v72_v7, 6  ;;  %v92_v15 = vrot.slane %v73_v8, 5  ;;  %2109 = vmatprep.subr.bf16.mxu0 %v2305_v0  ;;  %v95_v16 = vrot.slane %v74_v9, 4  ;;  %v282_v20 = vld [vmem:[%s2822_s0 + $0x2] sm:$0x1]  ;;  %2112 = vmatprep.subr.bf16.mxu1 %v2305_v0 }
  0x2b   :  { %v98_v17 = vrot.slane %v75_v10, 3  ;;  %v101_v18 = vrot.slane %v76_v11, 2  ;;  %v104_v19 = vrot.slane %v77_v12, 1  ;;  %v283_v22 = vld [vmem:[%s2822_s0 + $0xa] sm:$0x1]  ;;  %vm107_vm8 = vcmask 130048  }
  0x2c   :  { %v88_v21 = vsel %vm87_vm1, %v86_v13, %v70_v4  ;;  %v284_v23 = vld [vmem:[%s2822_s0 + $0x12] sm:$0x1]  ;;  %v285_v24 = vld [vmem:[%s2822_s0 + $0x1a] sm:$0x1]  ;;  %v286_v26 = vld [vmem:[%s2822_s0 + $0x22] sm:$0x1] }
  0x2d   :  { %v91_v25 = vsel %vm90_vm2, %v89_v14, %v88_v21  ;;  %v287_v27 = vld [vmem:[%s2822_s0 + $0x2a] sm:$0x1]  ;;  %v288_v28 = vld [vmem:[%s2822_s0 + $0x32] sm:$0x1]  ;;  %v289_v30 = vld [vmem:[%s2822_s0 + $0x3a] sm:$0x1] }
  0x2e   :  { %v94_v29 = vsel %vm93_vm3, %v92_v15, %v91_v25  ;;  %v298_v31 = vrot.slane %v283_v22, 7  ;;  %v300_v32 = vrot.slane %v284_v23, 6  ;;  %v302_v33 = vrot.slane %v285_v24, 5  ;;  %v486_v37 = vld [vmem:[%s2822_s0 + $0x4] sm:$0x1]  ;;  %v59_v25 = vld [vmem:[#allocation4] sm:$0xff] }
  0x2f   :  { %v97_v34 = vsel %vm96_vm4, %v95_v16, %v94_v29  ;;  %v304_v35 = vrot.slane %v286_v26, 4  ;;  %v306_v36 = vrot.slane %v287_v27, 3  ;;  %v308_v40 = vrot.slane %v288_v28, 2  ;;  %v487_v42 = vld [vmem:[%s2822_s0 + $0xc] sm:$0x1]  ;;  %v60_v26 = vld [vmem:[#allocation4 + $0x8] sm:$0xff] }
  0x30   :  { %v100_v38 = vsel %vm99_vm5, %v98_v17, %v97_v34  ;;  %v299_v39 = vsel %vm87_vm1, %v298_v31, %v282_v20  ;;  %v310_v41 = vrot.slane %v289_v30, 1  ;;  %v488_v43 = vld [vmem:[%s2822_s0 + $0x14] sm:$0x1]  ;;  %v489_v46 = vld [vmem:[%s2822_s0 + $0x1c] sm:$0x1]  ;;  %v502_v53 = vrot.slane %v487_v42, 7 }
  0x31   :  { %v103_v44 = vsel %vm102_vm6, %v101_v18, %v100_v38  ;;  %v301_v45 = vsel %vm90_vm2, %v300_v32, %v299_v39  ;;  %v490_v47 = vld [vmem:[%s2822_s0 + $0x24] sm:$0x1]  ;;  %v491_v48 = vld [vmem:[%s2822_s0 + $0x2c] sm:$0x1]  ;;  %v492_v51 = vld [vmem:[%s2822_s0 + $0x34] sm:$0x1]  ;;  %v2527_v32 = vpack.c.bf16 %v60_v26, %v59_v25 }
  0x32   :  { %v106_v49 = vsel %vm105_vm7, %v104_v19, %v103_v44  ;;  %v303_v50 = vsel %vm93_vm3, %v302_v33, %v301_v45  ;;  %v493_v52 = vld [vmem:[%s2822_s0 + $0x3c] sm:$0x1]  ;;  %v504_v54 = vrot.slane %v488_v43, 6  ;;  %v506_v56 = vrot.slane %v489_v46, 5  ;;  %v690_v59 = vld [vmem:[%s2822_s0 + $0x6] sm:$0x1] }
  0x33   :  { %1946 = vmatmul.mubr.msk.f32.vlgmr.msra.gmra.mrb[0].mxu0 %vm107_vm8, %v106_v49  ;;  %v305_v55 = vsel %vm96_vm4, %v304_v35, %v303_v50  ;;  %v508_v57 = vrot.slane %v490_v47, 4  ;;  %v510_v58 = vrot.slane %v491_v48, 3  ;;  %v503_v61 = vsel %vm87_vm1, %v502_v53, %v486_v37  ;;  %v691_v2 = vld [vmem:[%s2822_s0 + $0xe] sm:$0x1]  ;;  %v692_v3 = vld [vmem:[%s2822_s0 + $0x16] sm:$0x1] }
  0x34   :  { %2111 = vmatpush3.bf16.msra.mxu0 %v2388_v5  ;;  %1959 = vmatprep.mubr.msk.f32.mxu0 %vm2306_vm0, %v2307_v1  ;;  %v307_v60 = vsel %vm99_vm5, %v306_v36, %v305_v55  ;;  %v512_v62 = vrot.slane %v492_v51, 2  ;;  %v514_v63 = vrot.slane %v493_v52, 1  ;;  %v505_v6 = vsel %vm90_vm2, %v504_v54, %v503_v61  ;;  %v693_v7 = vld [vmem:[%s2822_s0 + $0x1e] sm:$0x1]  ;;  %v694_v8 = vld [vmem:[%s2822_s0 + $0x26] sm:$0x1] }
  0x35   :  { %2115 = vmatprep.subr.bf16.mxu0 %v2305_v0  ;;  %v309_v4 = vsel %vm102_vm6, %v308_v40, %v307_v60  ;;  %v695_v9 = vld [vmem:[%s2822_s0 + $0x2e] sm:$0x1]  ;;  %v507_v11 = vsel %vm93_vm3, %v506_v56, %v505_v6  ;;  %v696_v12 = vld [vmem:[%s2822_s0 + $0x36] sm:$0x1]  ;;  %v706_v13 = vrot.slane %v691_v2, 7  ;;  %v708_v14 = vrot.slane %v692_v3, 6 }
  0x36   :  { %v311_v10 = vsel %vm105_vm7, %v310_v41, %v309_v4  ;;  %v509_v15 = vsel %vm96_vm4, %v508_v57, %v507_v11  ;;  %v697_v16 = vld [vmem:[%s2822_s0 + $0x3e] sm:$0x1]  ;;  %v710_v17 = vrot.slane %v693_v7, 5  ;;  %v712_v18 = vrot.slane %v694_v8, 4  ;;  %v61_v34 = vld [vmem:[#allocation4 + $0x10] sm:$0xff]  ;;  %v62_v35 = vld [vmem:[#allocation4 + $0x18] sm:$0xff] }
  0x37   :  { %1960 = vmatmul.mubr.msk.f32.vlgmr.msra.gmra.mrb[2].mxu0 %vm107_vm8, %v311_v10  ;;  %v511_v19 = vsel %vm99_vm5, %v510_v58, %v509_v15  ;;  %v707_v20 = vsel %vm87_vm1, %v706_v13, %v690_v59  ;;  %v714_v21 = vrot.slane %v695_v9, 3  ;;  %v716_v24 = vrot.slane %v696_v12, 2  ;;  %v2551_v38 = vld [vmem:[%s2825_s3] ss:$0 sm:$0xff]  ;;  %s2308_s25 = smov 64   ;;  %s2309_s26 = smov 32  }
  0x38   :  { %2117 = vmatpush3.bf16.msra.mxu0 %v2388_v5  ;;  %1973 = vmatprep.mubr.msk.f32.mxu0 %vm2306_vm0, %v2307_v1  ;;  %v513_v22 = vsel %vm102_vm6, %v512_v62, %v511_v19  ;;  %v709_v23 = vsel %vm90_vm2, %v708_v14, %v707_v20  ;;  %v718_v29 = vrot.slane %v697_v16, 1  ;;  %v2534_v37 = vpack.c.bf16 %v62_v35, %v61_v34  ;;  %v180_v50 = vld [vmem:[%s2822_s0 + $0x1] sm:$0x1]  ;;  %v181_v51 = vld [vmem:[%s2822_s0 + $0x9] sm:$0x1] }
  0x39   :  { %2121 = vmatprep.subr.bf16.mxu0 %v2305_v0  ;;  %v515_v27 = vsel %vm105_vm7, %v514_v63, %v513_v22  ;;  %v711_v28 = vsel %vm93_vm3, %v710_v17, %v709_v23  ;;  %v182_v52 = vld [vmem:[%s2822_s0 + $0x11] sm:$0x1]  ;;  %v183_v53 = vld [vmem:[%s2822_s0 + $0x19] sm:$0x1]  ;;  %v184_v54 = vld [vmem:[%s2822_s0 + $0x21] sm:$0x1] }
  0x3a   :  { %v713_v30 = vsel %vm96_vm4, %v712_v18, %v711_v28  ;;  %v185_v55 = vld [vmem:[%s2822_s0 + $0x29] sm:$0x1]  ;;  %v186_v56 = vld [vmem:[%s2822_s0 + $0x31] sm:$0x1]  ;;  %v187_v57 = vld [vmem:[%s2822_s0 + $0x39] sm:$0x1] }
  0x3b   :  { %1974 = vmatmul.mubr.msk.f32.vlgmr.msra.gmra.mrb[4].mxu0 %vm107_vm8, %v515_v27  ;;  %v715_v31 = vsel %vm99_vm5, %v714_v21, %v713_v30  ;;  %v196_v58 = vrot.slane %v181_v51, 7  ;;  %v198_v59 = vrot.slane %v182_v52, 6  ;;  %v200_v60 = vrot.slane %v183_v53, 5  ;;  %v384_v63 = vld [vmem:[%s2822_s0 + $0x3] sm:$0x1] }
  0x3c   :  { %2123 = vmatpush3.bf16.msra.mxu0 %v2388_v5  ;;  %1987 = vmatprep.mubr.msk.f32.mxu0 %vm2306_vm0, %v2307_v1  ;;  %v717_v33 = vsel %vm102_vm6, %v716_v24, %v715_v31  ;;  %v202_v61 = vrot.slane %v184_v54, 4  ;;  %v204_v62 = vrot.slane %v185_v55, 3  ;;  %v206_v3 = vrot.slane %v186_v56, 2  ;;  %v385_v6 = vld [vmem:[%s2822_s0 + $0xb] sm:$0x1] }
  0x3d   :  { %2127 = vmatprep.subr.bf16.mxu0 %v2305_v0  ;;  %v719_v36 = vsel %vm105_vm7, %v718_v29, %v717_v33  ;;  %v197_v2 = vsel %vm87_vm1, %v196_v58, %v180_v50  ;;  %v208_v4 = vrot.slane %v187_v57, 1  ;;  %v386_v7 = vld [vmem:[%s2822_s0 + $0x13] sm:$0x1]  ;;  %v387_v9 = vld [vmem:[%s2822_s0 + $0x1b] sm:$0x1]  ;;  %v400_v15 = vrot.slane %v385_v6, 7 }
  0x3e   :  { %v199_v8 = vsel %vm90_vm2, %v198_v59, %v197_v2  ;;  %v388_v10 = vld [vmem:[%s2822_s0 + $0x23] sm:$0x1]  ;;  %v389_v11 = vld [vmem:[%s2822_s0 + $0x2b] sm:$0x1]  ;;  %v390_v13 = vld [vmem:[%s2822_s0 + $0x33] sm:$0x1] }
  0x3f   :  { %1988 = vmatmul.mubr.msk.f32.vlgmr.msra.gmra.mrb[6].mxu0 %vm107_vm8, %v719_v36  ;;  %v201_v12 = vsel %vm93_vm3, %v200_v60, %v199_v8  ;;  %v391_v14 = vld [vmem:[%s2822_s0 + $0x3b] sm:$0x1]  ;;  %v402_v16 = vrot.slane %v386_v7, 6  ;;  %v404_v18 = vrot.slane %v387_v9, 5  ;;  %v406_v19 = vrot.slane %v388_v10, 4 }
  0x40   :  { %2129 = vmatpush3.bf16.msra.mxu0 %v2527_v32  ;;  %2005 = vmatprep.mubr.msk.f32.mxu0 %vm2306_vm0, %v2307_v1  ;;  %v203_v17 = vsel %vm96_vm4, %v202_v61, %v201_v12  ;;  %v408_v20 = vrot.slane %v389_v11, 3  ;;  %v588_v21 = vld [vmem:[%s2822_s0 + $0x5] sm:$0x1]  ;;  %v401_v23 = vsel %vm87_vm1, %v400_v15, %v384_v63  ;;  %v410_v24 = vrot.slane %v390_v13, 2  ;;  %v589_v26 = vld [vmem:[%s2822_s0 + $0xd] sm:$0x1] }
  0x41   :  { %2130 = vmatprep.subr.bf16.mxu0 %v2305_v0  ;;  %v205_v22 = vsel %vm99_vm5, %v204_v62, %v203_v17  ;;  %v412_v25 = vrot.slane %v391_v14, 1  ;;  %v590_v27 = vld [vmem:[%s2822_s0 + $0x15] sm:$0x1]  ;;  %v403_v29 = vsel %vm90_vm2, %v402_v16, %v401_v23  ;;  %v591_v30 = vld [vmem:[%s2822_s0 + $0x1d] sm:$0x1]  ;;  %vm894_vm9 = vcmask 261120  }
  0x42   :  { %v207_v28 = vsel %vm102_vm6, %v206_v3, %v205_v22  ;;  %v592_v31 = vld [vmem:[%s2822_s0 + $0x25] sm:$0x1]  ;;  %v593_v33 = vld [vmem:[%s2822_s0 + $0x2d] sm:$0x1]  ;;  %v405_v36 = vsel %vm93_vm3, %v404_v18, %v403_v29  ;;  %v793_v54 = vld [vmem:[%s2822_s0 + $0xf] sm:$0x1] }
  0x43   :  { %v209_v35 = vsel %vm105_vm7, %v208_v4, %v207_v28  ;;  %v794_v55 = vld [vmem:[%s2822_s0 + $0x17] sm:$0x1]  ;;  %v795_v58 = vld [vmem:[%s2822_s0 + $0x1f] sm:$0x1]  ;;  %v796_v59 = vld [vmem:[%s2822_s0 + $0x27] sm:$0x1] }
  0x44   :  { %2132 = vmatpush3.bf16.msra.mxu0 %v2534_v37  ;;  %1953 = vmatmul.mubr.msk.f32.vlgmr.msra.gmra.mrb[0].mxu1 %vm107_vm8, %v209_v35  ;;  %v797_v60 = vld [vmem:[%s2822_s0 + $0x2f] sm:$0x1]  ;;  %v798_v63 = vld [vmem:[%s2822_s0 + $0x37] sm:$0x1]  ;;  %v808_v2 = vrot.slane %v793_v54, 7  ;;  %v810_v3 = vrot.slane %v794_v55, 6 }
  0x45   :  { %2139 = vmatprep.subr.bf16.mxu0 %v2305_v0  ;;  %2114 = vmatpush3.bf16.msra.mxu1 %v2388_v5  ;;  %v799_v6 = vld [vmem:[%s2822_s0 + $0x3f] sm:$0x1]  ;;  %v812_v7 = vrot.slane %v795_v58, 5  ;;  %v814_v8 = vrot.slane %v796_v59, 4  ;;  %v816_v11 = vrot.slane %v797_v60, 3  ;;  %v818_v14 = vrot.slane %v798_v63, 2 }
  0x46   :  { %1966 = vmatprep.mubr.msk.f32.mxu1 %vm2306_vm0, %v2307_v1  ;;  %2118 = vmatprep.subr.bf16.mxu1 %v2305_v0  ;;  %v820_v17 = vrot.slane %v799_v6, 1  ;;  %vm1830_vm10 = vcmask 31744  }
  0x47   :  { %2006 = vmatmul.mubr.f32.vlgmr.msra.gmra.mrb[0].mxu0 %v2307_v1 }
  0x48   :  { %2141 = vmatpush3.bf16.msra.mxu0 %v2527_v32  ;;  %2027 = vmatprep.mubr.msk.f32.mxu0 %vm2306_vm0, %v2307_v1 }
  0x49   :  { %2142 = vmatprep.subr.bf16.mxu0 %v2305_v0 }
  0x4c   :  { %2144 = vmatpush3.bf16.msra.mxu0 %v2534_v37 }
  0x4d   :  { %2151 = vmatprep.subr.bf16.mxu0 %v2305_v0 }
 0x11a   :  { %v964_v39 = vpop.f32.mrb[0].mxu0 }
 0x11b   :  { %v2184_v40 = vadd.f32 %v2551_v38, %v964_v39  ;;  %v2007_v41 = vpop.f32.mrb[1].mxu0  ;;  %v594_v39 = vld [vmem:[%s2822_s0 + $0x35] sm:$0x1] }
 0x11c   :  { %v604_v41 = vrot.slane %v589_v26, 7  ;;  %v614_v52 = vrot.slane %v594_v39, 2 }
 0x11d   :  { %2217 = vtanh.f32 %v2184_v40  ;;  %v595_v40 = vld [vmem:[%s2822_s0 + $0x3d] sm:$0x1] }
 0x11e   :  { %v605_v51 = vsel %vm87_vm1, %v604_v41, %v588_v21  ;;  %v616_v53 = vrot.slane %v595_v40, 1 }
 0x127   :  { %v2218_v42 = vpop.eup %2217 }
 0x128   :  { %974 = vrot.lane.b32.xlu0 %v2218_v42, %s2308_s25  ;;  %v970_v43 = vadd.f32 1.0, %v2218_v42  ;;  %v606_v42 = vrot.slane %v590_v27, 6 }
 0x12a   :  { %v2555_v44 = vmul.f32 0.5, %v970_v43  ;;  %v407_v43 = vsel %vm96_vm4, %v406_v19, %v405_v36  ;;  %v607_v57 = vsel %vm90_vm2, %v606_v42, %v605_v51 }
 0x12b   :  { %v409_v50 = vsel %vm99_vm5, %v408_v20, %v407_v43 }
 0x12c   :  { %v972_v47 = vmul.f32 0.0, %v2555_v44  ;;  %v411_v56 = vsel %vm102_vm6, %v410_v24, %v409_v50 }
 0x12d   :  { %v413_v61 = vsel %vm105_vm7, %v412_v25, %v411_v56 }
 0x12e   :  { %1967 = vmatmul.mubr.msk.f32.vlgmr.msra.gmra.mrb[2].mxu1 %vm107_vm8, %v413_v61 }
 0x12f   :  { %2120 = vmatpush3.bf16.msra.mxu1 %v2388_v5  ;;  %1980 = vmatprep.mubr.msk.f32.mxu1 %vm2306_vm0, %v2307_v1 }
 0x130   :  { %2124 = vmatprep.subr.bf16.mxu1 %v2305_v0 }
 0x19a   :  { %v975_v45 = vpop.permute.xlu0 %974 }
 0x19b   :  { %v977_v46 = vmul.f32 %v975_v45, %v2555_v44  ;;  %v608_v45 = vrot.slane %v591_v30, 5 }
 0x19d   :  { %979 = vrot.lane.b32.xlu0 %v977_v46, %s2309_s26  ;;  %v610_v46 = vrot.slane %v592_v31, 4  ;;  %v609_v62 = vsel %vm93_vm3, %v608_v45, %v607_v57 }
 0x19f   :  { %v611_v4 = vsel %vm96_vm4, %v610_v46, %v609_v62 }
 0x20f   :  { %v980_v48 = vpop.permute.xlu0 %979 }
 0x210   :  { %v2560_v49 = vadd.f32 %v980_v48, %v972_v47  ;;  %v612_v47 = vrot.slane %v593_v33, 3  ;;  %v792_v48 = vld [vmem:[%s2822_s0 + $0x7] sm:$0x1] }
 0x211   :  { %v809_v10 = vsel %vm87_vm1, %v808_v2, %v792_v48 }
 0x212   :  { %2219 = vtanh.f32 %v2560_v49  ;;  %v613_v9 = vsel %vm99_vm5, %v612_v47, %v611_v4  ;;  %v811_v13 = vsel %vm90_vm2, %v810_v3, %v809_v10 }
 0x213   :  { %v615_v12 = vsel %vm102_vm6, %v614_v52, %v613_v9  ;;  %v813_v16 = vsel %vm93_vm3, %v812_v7, %v811_v13 }
 0x214   :  { %v617_v15 = vsel %vm105_vm7, %v616_v53, %v615_v12  ;;  %v815_v18 = vsel %vm96_vm4, %v814_v8, %v813_v16 }
 0x215   :  { %1981 = vmatmul.mubr.msk.f32.vlgmr.msra.gmra.mrb[4].mxu1 %vm107_vm8, %v617_v15  ;;  %v817_v19 = vsel %vm99_vm5, %v816_v11, %v815_v18 }
 0x216   :  { %2126 = vmatpush3.bf16.msra.mxu1 %v2388_v5  ;;  %1994 = vmatprep.mubr.msk.f32.mxu1 %vm2306_vm0, %v2307_v1  ;;  %v819_v20 = vsel %vm102_vm6, %v818_v14, %v817_v19 }
 0x217   :  { %2133 = vmatprep.subr.bf16.mxu1 %v2305_v0  ;;  %v821_v21 = vsel %vm105_vm7, %v820_v17, %v819_v20 }
 0x219   :  { %1995 = vmatmul.mubr.msk.f32.vlgmr.msra.gmra.mrb[6].mxu1 %vm107_vm8, %v821_v21 }
 0x21a   :  { %2135 = vmatpush3.bf16.msra.mxu1 %v2527_v32  ;;  %2016 = vmatprep.mubr.msk.f32.mxu1 %vm2306_vm0, %v2307_v1 }
 0x21b   :  { %2136 = vmatprep.subr.bf16.mxu1 %v2305_v0 }
 0x21c   :  { %v2220_v34 = vpop.eup %2219 }
 0x21d   :  { %985 = vrot.lane.b32.xlu1 %v2220_v34, %s2308_s25 }
 0x21e   :  { %2138 = vmatpush3.bf16.msra.mxu1 %v2534_v37 }
 0x21f   :  { %2145 = vmatprep.subr.bf16.mxu1 %v2305_v0 }
 0x28f   :  { %v986_v5 = vpop.permute.xlu1 %985 }
 0x290   :  { %v988_v22 = vmul.f32 %v986_v5, %v2555_v44 }
 0x292   :  { %990 = vrot.lane.b32.xlu1 %v988_v22, %s2309_s26 }
 0x304   :  { %v991_v23 = vpop.permute.xlu1 %990 }
 0x305   :  { %2017 = vmatmul.mubr.msk.f32.vlgmr.msra.gmra.mrb[0].mxu1 %vm894_vm9, %v991_v23 }
 0x306   :  { %2147 = vmatpush3.bf16.msra.mxu1 %v2527_v32  ;;  %2038 = vmatprep.mubr.msk.f32.mxu1 %vm2306_vm0, %v2307_v1 }
 0x307   :  { %2148 = vmatprep.subr.bf16.mxu1 %v2305_v0 }
 0x30a   :  { %2150 = vmatpush3.bf16.msra.mxu1 %v2534_v37 }
 0x30b   :  { %2157 = vmatprep.subr.bf16.mxu1 %v2305_v0 }
 0x3d8   :  { %v1060_v24 = vpop.f32.mrb[0].mxu1 }
 0x3d9   :  { %v2185_v44 = vadd.f32 %v2551_v38, %v1060_v24  ;;  %v2018_v25 = vpop.f32.mrb[1].mxu1 }
 0x3db   :  { %2221 = vtanh.f32 %v2185_v44 }
 0x3e5   :  { %v2222_v26 = vpop.eup %2221 }
 0x3e6   :  { %1070 = vrot.lane.b32.xlu0 %v2222_v26, %s2308_s25  ;;  %v1066_v27 = vadd.f32 1.0, %v2222_v26 }
 0x3e8   :  { %v1067_v28 = vmul.f32 0.5, %v1066_v27 }
 0x3ea   :  { %v1068_v31 = vmul.f32 %v1067_v28, %v2560_v49 }
 0x458   :  { %v1071_v29 = vpop.permute.xlu0 %1070 }
 0x459   :  { %v1073_v30 = vmul.f32 %v1071_v29, %v1067_v28 }
 0x45b   :  { %1075 = vrot.lane.b32.xlu1 %v1073_v30, %s2309_s26 }
 0x4cd   :  { %v1076_v33 = vpop.permute.xlu1 %1075 }
 0x4ce   :  { %v1078_v34 = vadd.f32 %v1076_v33, %v1068_v31 }
 0x4d0   :  { %2223 = vtanh.f32 %v1078_v34 }
 0x4da   :  { %v2224_v35 = vpop.eup %2223 }
 0x4db   :  { %1081 = vrot.lane.b32.xlu0 %v2224_v35, %s2308_s25 }
 0x54d   :  { %v1082_v36 = vpop.permute.xlu0 %1081 }
 0x54e   :  { %v1084_v39 = vmul.f32 %v1082_v36, %v1067_v28 }
 0x550   :  { %1086 = vrot.lane.b32.xlu1 %v1084_v39, %s2309_s26 }
 0x5c2   :  { %v1087_v40 = vpop.permute.xlu1 %1086 }
 0x5c3   :  { %2028 = vmatmul.mubr.msk.f32.vlgmr.msra.gmra.mrb[2].mxu0 %vm894_vm9, %v1087_v40 }
 0x5c4   :  { %2153 = vmatpush3.bf16.msra.mxu0 %v2527_v32  ;;  %2049 = vmatprep.mubr.msk.f32.mxu0 %vm2306_vm0, %v2307_v1 }
 0x5c5   :  { %2154 = vmatprep.subr.bf16.mxu0 %v2305_v0 }
 0x5c8   :  { %2156 = vmatpush3.bf16.msra.mxu0 %v2534_v37 }
 0x5c9   :  { %2163 = vmatprep.subr.bf16.mxu0 %v2305_v0 }
 0x696   :  { %v1156_v49 = vpop.f32.mrb[2].mxu0 }
 0x697   :  { %v2186_v41 = vadd.f32 %v2551_v38, %v1156_v49  ;;  %v2029_v42 = vpop.f32.mrb[3].mxu0 }
 0x699   :  { %2225 = vtanh.f32 %v2186_v41 }
 0x6a3   :  { %v2226_v43 = vpop.eup %2225 }
 0x6a4   :  { %1166 = vrot.lane.b32.xlu0 %v2226_v43, %s2308_s25  ;;  %v1162_v45 = vadd.f32 1.0, %v2226_v43 }
 0x6a6   :  { %v1163_v46 = vmul.f32 0.5, %v1162_v45 }
 0x6a8   :  { %v1164_v50 = vmul.f32 %v1163_v46, %v1078_v34 }
 0x716   :  { %v1167_v47 = vpop.permute.xlu0 %1166 }
 0x717   :  { %v1169_v48 = vmul.f32 %v1167_v47, %v1163_v46 }
 0x719   :  { %1171 = vrot.lane.b32.xlu1 %v1169_v48, %s2309_s26 }
 0x78b   :  { %v1172_v51 = vpop.permute.xlu1 %1171 }
 0x78c   :  { %v1174_v52 = vadd.f32 %v1172_v51, %v1164_v50 }
 0x78e   :  { %2227 = vtanh.f32 %v1174_v52 }
 0x798   :  { %v2228_v53 = vpop.eup %2227 }
 0x799   :  { %1177 = vrot.lane.b32.xlu0 %v2228_v53, %s2308_s25 }
 0x80b   :  { %v1178_v54 = vpop.permute.xlu0 %1177 }
 0x80c   :  { %v1180_v55 = vmul.f32 %v1178_v54, %v1163_v46 }
 0x80e   :  { %1182 = vrot.lane.b32.xlu1 %v1180_v55, %s2309_s26 }
 0x880   :  { %v1183_v56 = vpop.permute.xlu1 %1182 }
 0x881   :  { %2039 = vmatmul.mubr.msk.f32.vlgmr.msra.gmra.mrb[2].mxu1 %vm894_vm9, %v1183_v56 }
 0x882   :  { %2159 = vmatpush3.bf16.msra.mxu1 %v2527_v32  ;;  %2060 = vmatprep.mubr.msk.f32.mxu1 %vm2306_vm0, %v2307_v1 }
 0x883   :  { %2160 = vmatprep.subr.bf16.mxu1 %v2305_v0 }
 0x886   :  { %2162 = vmatpush3.bf16.msra.mxu1 %v2534_v37 }
 0x887   :  { %2169 = vmatprep.subr.bf16.mxu1 %v2305_v0 }
 0x954   :  { %v1252_v57 = vpop.f32.mrb[2].mxu1 }
 0x955   :  { %v2187_v58 = vadd.f32 %v2551_v38, %v1252_v57  ;;  %v2040_v59 = vpop.f32.mrb[3].mxu1 }
 0x957   :  { %2229 = vtanh.f32 %v2187_v58 }
 0x961   :  { %v2230_v60 = vpop.eup %2229 }
 0x962   :  { %1262 = vrot.lane.b32.xlu0 %v2230_v60, %s2308_s25  ;;  %v1258_v61 = vadd.f32 1.0, %v2230_v60 }
 0x964   :  { %v1259_v62 = vmul.f32 0.5, %v1258_v61 }
 0x966   :  { %v1260_v3 = vmul.f32 %v1259_v62, %v1174_v52 }
 0x9d4   :  { %v1263_v63 = vpop.permute.xlu0 %1262 }
 0x9d5   :  { %v1265_v2 = vmul.f32 %v1263_v63, %v1259_v62 }
 0x9d7   :  { %1267 = vrot.lane.b32.xlu1 %v1265_v2, %s2309_s26 }
 0xa49   :  { %v1268_v4 = vpop.permute.xlu1 %1267 }
 0xa4a   :  { %v1270_v6 = vadd.f32 %v1268_v4, %v1260_v3 }
 0xa4c   :  { %2231 = vtanh.f32 %v1270_v6 }
 0xa56   :  { %v2232_v7 = vpop.eup %2231 }
 0xa57   :  { %1273 = vrot.lane.b32.xlu0 %v2232_v7, %s2308_s25 }
 0xac9   :  { %v1274_v8 = vpop.permute.xlu0 %1273 }
 0xaca   :  { %v1276_v9 = vmul.f32 %v1274_v8, %v1259_v62  ;;  %v1664_v8 = vld [vmem:[%s2826_s4 + $0x18] sm:$0xff] }
 0xacc   :  { %1278 = vrot.lane.b32.xlu1 %v1276_v9, %s2309_s26 }
 0xb3e   :  { %v1279_v10 = vpop.permute.xlu1 %1278 }
 0xb3f   :  { %2050 = vmatmul.mubr.msk.f32.vlgmr.msra.gmra.mrb[4].mxu0 %vm894_vm9, %v1279_v10 }
 0xb40   :  { %2165 = vmatpush3.bf16.msra.mxu0 %v2527_v32  ;;  %2071 = vmatprep.mubr.msk.f32.mxu0 %vm2306_vm0, %v2307_v1 }
 0xb41   :  { %2166 = vmatprep.subr.bf16.mxu0 %v2305_v0 }
 0xb44   :  { %2168 = vmatpush3.bf16.msra.mxu0 %v2534_v37 }
 0xb45   :  { %2175 = vmatprep.subr.bf16.mxu0 %v2305_v0 }
 0xc12   :  { %v1348_v11 = vpop.f32.mrb[4].mxu0 }
 0xc13   :  { %v2188_v12 = vadd.f32 %v2551_v38, %v1348_v11  ;;  %v2051_v13 = vpop.f32.mrb[5].mxu0 }
 0xc15   :  { %2233 = vtanh.f32 %v2188_v12 }
 0xc1f   :  { %v2234_v14 = vpop.eup %2233 }
 0xc20   :  { %1358 = vrot.lane.b32.xlu0 %v2234_v14, %s2308_s25  ;;  %v1354_v15 = vadd.f32 1.0, %v2234_v14  ;;  %v1748_v14 = vld [vmem:[%s2828_s6] sm:$0xff] }
 0xc22   :  { %v1355_v16 = vmul.f32 0.5, %v1354_v15  ;;  %v1749_v15 = vld [vmem:[%s2828_s6 + $0x8] sm:$0xff] }
 0xc24   :  { %v1356_v19 = vmul.f32 %v1355_v16, %v1270_v6  ;;  %v1663_v6 = vld [vmem:[%s2826_s4 + $0x10] sm:$0xff] }
 0xc25   :  { %v2179_v9 = vpack.c.bf16 %v1664_v8, %v1663_v6 }
 0xc92   :  { %v1359_v17 = vpop.permute.xlu0 %1358 }
 0xc93   :  { %v1361_v18 = vmul.f32 %v1359_v17, %v1355_v16 }
 0xc95   :  { %1363 = vrot.lane.b32.xlu1 %v1361_v18, %s2309_s26 }
 0xd07   :  { %v1364_v20 = vpop.permute.xlu1 %1363 }
 0xd08   :  { %v1366_v21 = vadd.f32 %v1364_v20, %v1356_v19 }
 0xd0a   :  { %2235 = vtanh.f32 %v1366_v21 }
 0xd14   :  { %v2236_v5 = vpop.eup %2235 }
 0xd15   :  { %1369 = vrot.lane.b32.xlu0 %v2236_v5, %s2308_s25 }
 0xd87   :  { %v1370_v22 = vpop.permute.xlu0 %1369 }
 0xd88   :  { %v1372_v23 = vmul.f32 %v1370_v22, %v1355_v16  ;;  %v1865_v16 = vld [vmem:[%s2827_s5] ss:$0 sm:$0xff] }
 0xd8a   :  { %1374 = vrot.lane.b32.xlu1 %v1372_v23, %s2309_s26 }
 0xdfc   :  { %v1375_v24 = vpop.permute.xlu1 %1374 }
 0xdfd   :  { %2061 = vmatmul.mubr.msk.f32.vlgmr.msra.gmra.mrb[4].mxu1 %vm894_vm9, %v1375_v24 }
 0xdfe   :  { %2171 = vmatpush3.bf16.msra.mxu1 %v2527_v32  ;;  %2082 = vmatprep.mubr.msk.f32.mxu1 %vm2306_vm0, %v2307_v1 }
 0xdff   :  { %2172 = vmatprep.subr.bf16.mxu1 %v2305_v0 }
 0xe02   :  { %2174 = vmatpush3.bf16.msra.mxu1 %v2534_v37 }
 0xe03   :  { %2181 = vmatprep.subr.bf16.mxu1 %v2305_v0 }
 0xed0   :  { %v1444_v44 = vpop.f32.mrb[4].mxu1 }
 0xed1   :  { %v2189_v25 = vadd.f32 %v2551_v38, %v1444_v44  ;;  %v2062_v26 = vpop.f32.mrb[5].mxu1 }
 0xed3   :  { %2237 = vtanh.f32 %v2189_v25 }
 0xedd   :  { %v2238_v27 = vpop.eup %2237 }
 0xede   :  { %1454 = vrot.lane.b32.xlu0 %v2238_v27, %s2308_s25  ;;  %v1450_v28 = vadd.f32 1.0, %v2238_v27 }
 0xee0   :  { %v1451_v29 = vmul.f32 0.5, %v1450_v28 }
 0xee2   :  { %v1452_v31 = vmul.f32 %v1451_v29, %v1366_v21  ;;  %v1867_v21 = vld [vmem:[%s2829_s7] ss:$0 sm:$0xff] }
 0xf50   :  { %v1455_v32 = vpop.permute.xlu0 %1454 }
 0xf51   :  { %v1457_v30 = vmul.f32 %v1455_v32, %v1451_v29 }
 0xf53   :  { %1459 = vrot.lane.b32.xlu1 %v1457_v30, %s2309_s26 }
 0xfc5   :  { %v1460_v33 = vpop.permute.xlu1 %1459 }
 0xfc6   :  { %v1462_v34 = vadd.f32 %v1460_v33, %v1452_v31 }
 0xfc8   :  { %2239 = vtanh.f32 %v1462_v34 }
 0xfd2   :  { %v2240_v37 = vpop.eup %2239 }
 0xfd3   :  { %1465 = vrot.lane.b32.xlu0 %v2240_v37, %s2308_s25 }
0x1045   :  { %v1466_v35 = vpop.permute.xlu0 %1465 }
0x1046   :  { %v1468_v36 = vmul.f32 %v1466_v35, %v1451_v29 }
0x1048   :  { %1470 = vrot.lane.b32.xlu1 %v1468_v36, %s2309_s26 }
0x10ba   :  { %v1471_v39 = vpop.permute.xlu1 %1470 }
0x10bb   :  { %2072 = vmatmul.mubr.msk.f32.vlgmr.msra.gmra.mrb[6].mxu0 %vm894_vm9, %v1471_v39 }
0x10bc   :  { %2093 = vmatprep.mubr.msk.f32.mxu0 %vm2306_vm0, %v2307_v1 }
0x118e   :  { %v1540_v40 = vpop.f32.mrb[6].mxu0 }
0x118f   :  { %v2190_v49 = vadd.f32 %v2551_v38, %v1540_v40  ;;  %v2073_v41 = vpop.f32.mrb[7].mxu0 }
0x1191   :  { %2241 = vtanh.f32 %v2190_v49 }
0x119b   :  { %v2242_v42 = vpop.eup %2241 }
0x119c   :  { %1550 = vrot.lane.b32.xlu0 %v2242_v42, %s2308_s25  ;;  %v1546_v43 = vadd.f32 1.0, %v2242_v42 }
0x119e   :  { %v1547_v45 = vmul.f32 0.5, %v1546_v43 }
0x11a0   :  { %v1548_v48 = vmul.f32 %v1547_v45, %v1462_v34 }
0x120e   :  { %v1551_v46 = vpop.permute.xlu0 %1550 }
0x120f   :  { %v1553_v47 = vmul.f32 %v1551_v46, %v1547_v45 }
0x1211   :  { %1555 = vrot.lane.b32.xlu1 %v1553_v47, %s2309_s26 }
0x1283   :  { %v1556_v50 = vpop.permute.xlu1 %1555 }
0x1284   :  { %v1558_v51 = vadd.f32 %v1556_v50, %v1548_v48 }
0x1286   :  { %2243 = vtanh.f32 %v1558_v51 }
0x1290   :  { %v2244_v52 = vpop.eup %2243 }
0x1291   :  { %1561 = vrot.lane.b32.xlu0 %v2244_v52, %s2308_s25 }
0x1303   :  { %v1562_v53 = vpop.permute.xlu0 %1561 }
0x1304   :  { %v1564_v54 = vmul.f32 %v1562_v53, %v1547_v45 }
0x1306   :  { %1566 = vrot.lane.b32.xlu1 %v1564_v54, %s2309_s26 }
0x1378   :  { %v1567_v55 = vpop.permute.xlu1 %1566 }
0x1379   :  { %2083 = vmatmul.mubr.msk.f32.vlgmr.msra.gmra.mrb[6].mxu1 %vm894_vm9, %v1567_v55 }
0x137a   :  { %2100 = vmatprep.mubr.msk.f32.mxu1 %vm2306_vm0, %v2307_v1  ;;  %v1661_v1 = vld [vmem:[%s2826_s4] sm:$0xff] }
0x144c   :  { %v1636_v56 = vpop.f32.mrb[6].mxu1 }
0x144d   :  { %v2191_v57 = vadd.f32 %v2551_v38, %v1636_v56  ;;  %v2084_v58 = vpop.f32.mrb[7].mxu1  ;;  %v1662_v38 = vld [vmem:[%s2826_s4 + $0x8] sm:$0xff] }
0x144e   :  { %v2176_v7 = vpack.c.bf16 %v1662_v38, %v1661_v1 }
0x144f   :  { %2245 = vtanh.f32 %v2191_v57 }
0x1450   :  { %2177 = vmatpush3.bf16.msra.mxu0 %v2176_v7 }
0x1451   :  { %2178 = vmatprep.subr.bf16.mxu0 %v2305_v0  ;;  %v2182_v0 = vpack.c.bf16 %v1749_v15, %v1748_v14 }
0x1453   :  { %2183 = vmatpush3.bf16.msra.mxu1 %v2182_v0 }
0x1454   :  { %2180 = vmatpush3.bf16.msra.mxu0 %v2179_v9 }
0x1459   :  { %v2246_v59 = vpop.eup %2245 }
0x145a   :  { %1646 = vrot.lane.b32.xlu0 %v2246_v59, %s2308_s25  ;;  %v1642_v60 = vadd.f32 1.0, %v2246_v59 }
0x145c   :  { %v1643_v61 = vmul.f32 0.5, %v1642_v60 }
0x145e   :  { %v1644_v2 = vmul.f32 %v1643_v61, %v1558_v51 }
0x14cc   :  { %v1647_v62 = vpop.permute.xlu0 %1646 }
0x14cd   :  { %v1649_v63 = vmul.f32 %v1647_v62, %v1643_v61 }
0x14cf   :  { %1651 = vrot.lane.b32.xlu1 %v1649_v63, %s2309_s26 }
0x1541   :  { %v1652_v3 = vpop.permute.xlu1 %1651 }
0x1542   :  { %v1654_v4 = vadd.f32 %v1652_v3, %v1644_v2 }
0x1544   :  { %2247 = vtanh.f32 %v1654_v4 }
0x154e   :  { %v2248_v10 = vpop.eup %2247 }
0x154f   :  { %1657 = vrot.lane.b32.xlu0 %v2248_v10, %s2308_s25 }
0x15c1   :  { %v1658_v11 = vpop.permute.xlu0 %1657 }
0x15c2   :  { %v1660_v12 = vmul.f32 %v1658_v11, %v1643_v61 }
0x15c4   :  { %1673 = vrot.lane.b32.xlu1 %v1660_v12, %s2309_s26 }
0x1636   :  { %v1674_v13 = vpop.permute.xlu1 %1673 }
0x1637   :  { %2094 = vmatmul.mubr.msk.f32.vlgmr.msra.gmra.mrb[8].mxu0 %vm894_vm9, %v1674_v13 }
0x170a   :  { %v1743_v17 = vpop.f32.mrb[8].mxu0 }
0x170b   :  { %v1744_v18 = vadd.f32 %v1865_v16, %v1743_v17  ;;  %v2095_v19 = vpop.f32.mrb[9].mxu0 }
0x170d   :  { %v1747_v20 = vmax.f32 %v1744_v18, 0.0 }
0x170f   :  { %2101 = vmatmul.mubr.msk.f32.vlgmr.msra.gmra.mrb[8].mxu1 %vm107_vm8, %v1747_v20 }
0x17e2   :  { %v1826_v5 = vpop.f32.mrb[8].mxu1 }
0x17e3   :  { %v1827_v22 = vadd.f32 %v1867_v21, %v1826_v5  ;;  %v2102_v23 = vpop.f32.mrb[9].mxu1 }
0x17e5   :  { %v1831_v24 = vsel %vm1830_vm10, %v1827_v22, -inf }
0x17e6   :  { %1832 = vmax.xlane.f32.xlu0 %v1831_v24 }
0x1873   :  { %v1833_v44 = vpop.xlane.xlu0 %1832 }
0x1874   :  { %v1834_v25 = vsub.f32 %v1827_v22, %v1833_v44 }
0x1876   :  { %v1835_v26 = vmul.f32 1.442695, %v1834_v25 }
0x1878   :  { %2249 = vpow2.f32 %v1835_v26 }
0x1882   :  { %v2250_v27 = vpop.eup %2249 }
0x1883   :  { %v1837_v28 = vsel %vm1830_vm10, %v2250_v27, 0.0 }
0x1884   :  { %1838 = vadd.xlane.f32.xlu1 %v1837_v28 }
0x1911   :  { %v1839_v29 = vpop.xlane.xlu1 %1838 }
0x1912   :  { %2251 = vrcp.f32 %v1839_v29 }
0x191c   :  { %v2252_v32 = vpop.eup %2251 }
0x191d   :  { %v1841_v30 = vmul.f32 %v2252_v32, %v2250_v27 }
0x191f   :  { %1842 = vst.msk [vmem:[%s2830_s8] sm:$0xff] %vm1830_vm10, %v1841_v30 }
0x1920   :  { %1847 = vsyncpa [#allocation3], 1 }
0x1921   :  { %1848 = vsyncpa [#allocation5], 1 }

</bundles_post_ra>
